<compile_context>
chip_gen: v5e
topology: v5e:2x2
jax: 0.10.0
libtpu: 0.0.40
codegen_flags: <defaults>
</compile_context>

<pallas_src>
import math

import jax
import jax.numpy as jnp
from jax.experimental import pallas as pl
from jax.experimental.pallas import tpu as pltpu


# ----------------------------------------------------------------------------
# Positional encodings (standard 1-D sinusoidal, shape (num_patches, embed_dim))
# ----------------------------------------------------------------------------
def get_positional_encodings(embed_dim: int, num_patches: int) -> jnp.ndarray:
    assert embed_dim % 2 == 0, "sinusoidal positional encodings require even embed_dim"
    position = jnp.arange(num_patches, dtype=jnp.float32)[:, None]          # (N, 1)
    div_term = jnp.exp(
        jnp.arange(0, embed_dim, 2, dtype=jnp.float32)
        * (-math.log(10000.0) / embed_dim)
    )                                                                        # (E/2,)
    pe = jnp.zeros((num_patches, embed_dim), dtype=jnp.float32)
    pe = pe.at[:, 0::2].set(jnp.sin(position * div_term))
    pe = pe.at[:, 1::2].set(jnp.cos(position * div_term))
    return pe


# ----------------------------------------------------------------------------
# Row-tile plan: multiple of 8 (or full extent), divides num_patches, <= 512,
# and keeps >= 2 parallel blocks overall so v7x megacore has work on both TCs.
# ----------------------------------------------------------------------------
def _row_tile(num_patches: int, batch: int) -> int:
    n = num_patches
    if n % 8 != 0:
        # e.g. 196 patches (224/16 ViT): use the full extent (still (8,128)-legal
        # because a block dim equal to the full array dim is always allowed).
        return n
    divisors = [d for d in range(8, min(n, 512) + 1, 8) if n % d == 0]
    if not divisors:
        return n
    if batch == 1:
        two_plus = [d for d in divisors if n // d >= 2]
        if two_plus:
            return max(two_plus)
    return max(divisors)


# ----------------------------------------------------------------------------
# Pallas kernel: one output tile per grid step, whole contraction in one pass.
#   out = patches @ W  (+ pos_enc + conv_bias, folded into pos_ref)
# ----------------------------------------------------------------------------
def encoder_embed_kernel(p_ref, w_ref, pos_ref, o_ref):
    # p_ref:   (1, tm, K)   patch rows (bf16 or f32)
    # w_ref:   (K, E)       full weight matrix (DMA'd once; constant index_map)
    # pos_ref: (tm, E)      positional encodings + conv bias
    # o_ref:   (1, tm, E)   output tile
    acc = jnp.dot(p_ref[0], w_ref[...], preferred_element_type=jnp.float32)
    o_ref[0] = (acc + pos_ref[...].astype(jnp.float32)).astype(o_ref.dtype)


# ----------------------------------------------------------------------------
# Init: hoist weight transpose / positional table / dtype casts out of forward.
# ----------------------------------------------------------------------------
def init_encoder_embedding(conv_w, conv_b, patch_size, image_size,
                           compute_dtype=jnp.bfloat16, out_dtype=None):
    """conv_w: (embed_dim, C, P, P) PyTorch Conv2d weight; conv_b: (embed_dim,)."""
    embed_dim, in_chans, P, _ = conv_w.shape
    assert P == patch_size
    num_patches = (image_size // patch_size) ** 2
    patch_dim = in_chans * P * P

    # (patch_dim, embed_dim) matmul weight (stride-P conv == patchified matmul).
    w_mat = conv_w.reshape(embed_dim, patch_dim).T.astype(compute_dtype)

    # Fold conv bias into the positional-encoding table; store in compute dtype
    # to halve its HBM stream (f32 epilogue add in-kernel).
    pos = get_positional_encodings(embed_dim, num_patches)                 # (N, E)
    pos_bias = (pos + conv_b[None, :].astype(jnp.float32)).astype(compute_dtype)

    return {
        "w": w_mat,
        "pos_bias": pos_bias,
        "patch_size": P,
        "in_chans": in_chans,
        "embed_dim": embed_dim,
        "patch_dim": patch_dim,
        "num_patches": num_patches,
        "compute_dtype": compute_dtype,
        "out_dtype": compute_dtype if out_dtype is None else out_dtype,
    }


# ----------------------------------------------------------------------------
# Forward pass
# ----------------------------------------------------------------------------
def encoder_embedding_forward(x_nchw, params):
    """x_nchw: (B, C, H, W) -> (B, num_patches, embed_dim)."""
    B, C, H, W = x_nchw.shape
    P = params["patch_size"]
    assert C == params["in_chans"]
    Hp, Wp = H // P, W // P
    n_patch = Hp * Wp
    assert n_patch == params["num_patches"]

    K = params["patch_dim"]
    E = params["embed_dim"]
    tm = _row_tile(n_patch, B)
    assert n_patch % tm == 0

    # Patch extraction (single fused XLA transpose+cast pass; no padding).
    patches = (
        x_nchw.reshape(B, C, Hp, P, Wp, P)
        .transpose(0, 2, 4, 1, 3, 5)                  # (B, Hp, Wp, C, P, P)
        .reshape(B, n_patch, K)
        .astype(params["compute_dtype"])
    )

    grid = (n_patch // tm, B)                          # (row-tiles, batch)

    out = pl.pallas_call(
        encoder_embed_kernel,
        out_shape=jax.ShapeDtypeStruct((B, n_patch, E), params["out_dtype"]),
        grid=grid,
        in_specs=[
            pl.BlockSpec((1, tm, K), lambda i, b: (b, i, 0)),   # patches
            pl.BlockSpec((K, E), lambda i, b: (0, 0)),          # weight (resident)
            pl.BlockSpec((tm, E), lambda i, b: (i, 0)),         # pos+bias
        ],
        out_specs=pl.BlockSpec((1, tm, E), lambda i, b: (b, i, 0)),
        compiler_params=pltpu.CompilerParams(
            dimension_semantics=("parallel", "parallel"),
            vmem_limit_bytes=40 * 1024 * 1024,
        ),
    )(patches, params["w"], params["pos_bias"])

    return out


# ----------------------------------------------------------------------------
# Demo / correctness check
# ----------------------------------------------------------------------------
if __name__ == "__main__":
    B, C, IMG, P, E = 2, 4, 16, 4, 32
    num_patches = (IMG // P) ** 2

    key = jax.random.PRNGKey(0)
    kx, kw, kb = jax.random.split(key, 3)
    x = jax.random.normal(kx, (B, C, IMG, IMG), dtype=jnp.float32)
    conv_w = 0.02 * jax.random.normal(kw, (E, C, P, P), dtype=jnp.float32)
    conv_b = 0.02 * jax.random.normal(kb, (E,), dtype=jnp.float32)

    # Plain-JAX reference (patchified matmul == stride-P conv, + pos enc + bias).
    patches_ref = x.reshape(B, C, IMG // P, P, IMG // P, P).transpose(0, 2, 4, 1, 3, 5)
    patches_ref = patches_ref.reshape(B, num_patches, C * P * P)
    ref = patches_ref @ conv_w.reshape(E, -1).T + conv_b[None, None, :]
    ref = ref + get_positional_encodings(E, num_patches)[None]

    # f32 path: tight check.
    params_f32 = init_encoder_embedding(conv_w, conv_b, P, IMG,
                                        compute_dtype=jnp.float32)
    out_f32 = jax.block_until_ready(encoder_embedding_forward(x, params_f32))
    assert out_f32.shape == (B, num_patches, E)
    assert out_f32.dtype == jnp.float32
    assert jnp.allclose(out_f32, ref, atol=1e-4, rtol=1e-4)

    # bf16 fast path (default): relaxed tolerance.
    params_bf16 = init_encoder_embedding(conv_w, conv_b, P, IMG,
                                         compute_dtype=jnp.bfloat16)
    out_bf16 = jax.block_until_ready(encoder_embedding_forward(x, params_bf16))
    assert out_bf16.shape == (B, num_patches, E)
    assert out_bf16.dtype == jnp.bfloat16
    assert jnp.allclose(out_bf16.astype(jnp.float32), ref, atol=2e-2, rtol=2e-2)

    print("KERNEL_OK")
</pallas_src>

<mosaic_0001>
module attributes {stable_mosaic.version = 11 : i64} {
  func.func @encoder_embed_kernel(%arg0: i32, %arg1: i32, %arg2: memref<1x16x64xf32, #tpu.memory_space<vmem>>, %arg3: memref<64x32xf32, #tpu.memory_space<vmem>>, %arg4: memref<16x32xf32, #tpu.memory_space<vmem>>, %arg5: memref<1x16x32xf32, #tpu.memory_space<vmem>>) attributes {dimension_semantics = [#tpu.dimension_semantics<parallel>, #tpu.dimension_semantics<parallel>], iteration_bounds = array<i64: 1, 2>, scalar_prefetch = 0 : i64, scratch_operands = 0 : i64, tpu.core_type = #tpu.core_type<tc>, window_params = [{transform_indices = @transform_0, window_bounds = array<i64: 1, 16, 64>}, {pipeline_mode = #tpu.pipeline_mode<synchronous>, transform_indices = @transform_1, window_bounds = array<i64: 64, 32>}, {transform_indices = @transform_2, window_bounds = array<i64: 16, 32>}, {transform_indices = @transform_3, window_bounds = array<i64: 1, 16, 32>}]} {
    %c0 = arith.constant 0 : index
    %c0_0 = arith.constant 0 : index
    %c0_1 = arith.constant 0 : index
    %0 = vector.load %arg2[%c0, %c0_0, %c0_1] : memref<1x16x64xf32, #tpu.memory_space<vmem>>, vector<1x16x64xf32>
    %1 = vector.shape_cast %0 : vector<1x16x64xf32> to vector<16x64xf32>
    %c0_2 = arith.constant 0 : index
    %c0_3 = arith.constant 0 : index
    %2 = vector.load %arg3[%c0_2, %c0_3] : memref<64x32xf32, #tpu.memory_space<vmem>>, vector<64x32xf32>
    %cst = arith.constant dense<0.000000e+00> : vector<16x32xf32>
    %3 = tpu.matmul %1, %2, %cst {dimension_numbers = #tpu.dot_dimension_numbers<[1], [0], [0], [1], [0, 0, 1, 1], [], []>} : vector<16x64xf32>, vector<64x32xf32>, vector<16x32xf32> -> vector<16x32xf32>
    %c0_4 = arith.constant 0 : index
    %c0_5 = arith.constant 0 : index
    %4 = vector.load %arg4[%c0_4, %c0_5] : memref<16x32xf32, #tpu.memory_space<vmem>>, vector<16x32xf32>
    %5 = arith.addf %3, %4 : vector<16x32xf32>
    %c0_6 = arith.constant 0 : index
    %c0_7 = arith.constant 0 : index
    %c0_8 = arith.constant 0 : index
    %6 = vector.load %arg5[%c0_6, %c0_7, %c0_8] : memref<1x16x32xf32, #tpu.memory_space<vmem>>, vector<1x16x32xf32>
    %7 = vector.shape_cast %6 : vector<1x16x32xf32> to vector<16x32xf32>
    %8 = vector.shape_cast %5 : vector<16x32xf32> to vector<1x16x32xf32>
    tpu.vector_store %arg5[%c0_6, %c0_7, %c0_8], %8 {strides = array<i32>} : memref<1x16x32xf32, #tpu.memory_space<vmem>>, vector<1x16x32xf32>,
    return
  }
  func.func @transform_0(%arg0: i32, %arg1: i32) -> (i32, i32, i32) {
    %c0_i32 = arith.constant 0 : i32
    %c0_i32_0 = arith.constant 0 : i32
    return %arg1, %arg0, %c0_i32 : i32, i32, i32
  }
  func.func @transform_1(%arg0: i32, %arg1: i32) -> (i32, i32) {
    %c0_i32 = arith.constant 0 : i32
    %c0_i32_0 = arith.constant 0 : i32
    %c0_i32_1 = arith.constant 0 : i32
    return %c0_i32, %c0_i32_0 : i32, i32
  }
  func.func @transform_2(%arg0: i32, %arg1: i32) -> (i32, i32) {
    %c0_i32 = arith.constant 0 : i32
    %c0_i32_0 = arith.constant 0 : i32
    return %arg0, %c0_i32 : i32, i32
  }
  func.func @transform_3(%arg0: i32, %arg1: i32) -> (i32, i32, i32) {
    %c0_i32 = arith.constant 0 : i32
    %c0_i32_0 = arith.constant 0 : i32
    return %arg1, %arg0, %c0_i32 : i32, i32, i32
  }
}

</mosaic_0001>

<bundles_post_ra>
// kernel: tpu_custom_call.1
= control target key start
LH: loop header
LB: loop body
LE: loop exit
PB: predicated region body
PF: predicated region fallthrough
CT: control target
= control target key end

     0   :  { %8 = vsyncpa [#allocation3], 0  ;;  %s691_s0 = inlined_call_operand.vmem [shape: f32[2,16,64], index: 0, kind: input, shape index: {}]   ;;  %s692_s1 = inlined_call_operand.vmem [shape: f32[64,32], index: 1, kind: input, shape index: {}]   ;;  %s693_s2 = inlined_call_operand.vmem [shape: f32[16,32], index: 2, kind: input, shape index: {}]   ;;  %s694_s3 = inlined_call_operand.hbm [shape: f32[2,16,32], index: 3, kind: output, shape index: {}]  }
   0x1   :  { %10 = vsyncpa [#allocation3 + $0x1], 0  ;;  %s564_s12 = smov 0   ;;  %s566_s13 = smov 0  }
   0x2   :  { %s568_s14 = smov 0   ;;  %s570_s15 = smov 0  }
   0x3   :  { %s572_s16 = smov 0   ;;  %s574_s17 = smov 0  }
   0x4 LB: > { %s379_s18 = sadd.s32 4294967295, %s540_s17   ;;  %s380_s19 = sadd.s32 4294967294, %s540_s17   ;;  %s540_s17 = sphi %s574_s17, %s16_s17   ;;  %s536_s16 = sphi %s572_s16, %s701_s16   ;;  %s532_s15 = sphi %s570_s15, %s700_s15   ;;  %s528_s14 = sphi %s568_s14, %s699_s14   ;;  %s524_s13 = sphi %s566_s13, %s698_s13   ;;  %s520_s12 = sphi %s564_s12, %s697_s12  }
   0x5   : > { %s25_s20 = sadd.s32 1, %s536_s16  ;;  %s112_s21 = sadd.s32 1, %s528_s14 }
   0x6   : > { %p26_p0 = scmp.ge.s32.totalorder %s25_s20, 2  ;;  %p122_p1 = scmp.ne.s32.totalorder %s528_s14, %s524_s13 }
   0x7   : > { %p123_p2 = scmp.eq.s32.totalorder %s379_s18, 1  ;;  %p128_p3 = scmp.ne.s32.totalorder %s524_s13, %s520_s12 }
   0x8   : > { %s703_s20 = smov (%p26_p0, %s25_s20), 0  ;;  %p129_p5 = scmp.eq.s32.totalorder %s380_s19, 1 }
   0x9   : > { %p604_p4 = por %p123_p2, %p122_p1  ;;  %s107_s23 = ssub.s32 %s536_s16, %s703_s20 }
   0xa   : > { %p384_p6 = scmp.ge.s32.totalorder %s540_s17, 1  ;;  %p110_p7 = scmp.eq.s32.totalorder %s107_s23, 0 }
   0xb   : > { %p611_p8 = por %p129_p5, %p128_p3  ;;  %p172_p9 = scmp.lt.s32.totalorder %s540_s17, 3 }
   0xc   : > { %s617_s25 = scalar_select %p110_p7, %s528_s14, %s112_s21  }
   0xd   : > { %p173_p10 = pnand %p384_p6, %p172_p9 }
   0xe   : > { %p206_p11 = scmp.lt.s32.totalorder (!%p173_p10), %s532_s15, 1  ;;  %s202_s30 = sand.u32 (!%p173_p10), 1, %s524_s13  }
   0xf   : > { %176 = sbr.rel (%p173_p10) target bundleno = 169 (0xa9), region = 32  ;;  %s385_s4 = sshll.u32 (!%p173_p10), %s202_s30, 4 }
  0x10   : > { %s204_s11 = scalar_lea.vmem (!%p173_p10), [#allocation2], %s385_s4  ;;  %s482_s4 = scalar_lea.hbm (!%p173_p10), %s694_s3, 32 }
  0x11   : > { %s282_s18 = sshll.u32 (!%p173_p10), %s204_s11, 4  ;;  %s283_s18 = int_to_ptr.vmem [resolvable:$true] %s282_s18 }
  0x14   : > { %v231_v0 = vld [vmem:[%s692_s1 + $0x38] sm:$0xff]  ;;  %v230_v1 = vld [vmem:[%s692_s1 + $0x30] sm:$0xff]  ;;  %v229_v2 = vld [vmem:[%s692_s1 + $0x28] sm:$0xff]  ;;  %s207_s5 = scalar_select %p206_p11, %s532_s15, 1  ;;  %vm234_vm0 = vcmask 523264   ;;  %vm264_vm1 = vcmask 261120  }
  0x15   : > { %249 = vmatpush.msra.mxu0 %v231_v0  ;;  %397 = vmatpush.msra.mxu1 %v231_v0  ;;  %v228_v3 = vld [vmem:[%s692_s1 + $0x20] sm:$0xff]  ;;  %v227_v4 = vld [vmem:[%s692_s1 + $0x18] sm:$0xff]  ;;  %v226_v5 = vld [vmem:[%s692_s1 + $0x10] sm:$0xff] }
  0x16   : > { %s395_s10 = sshll.u32 %s207_s5, 4  ;;  %v225_v6 = vld [vmem:[%s692_s1 + $0x8] sm:$0xff]  ;;  %v224_v7 = vld [vmem:[%s692_s1] sm:$0xff]  ;;  %s396_s5 = sshll.u32 %s532_s15, 4 }
  0x17   : > { %250 = vmatpush.msra.mxu0 %v230_v1  ;;  %398 = vmatpush.msra.mxu1 %v230_v1  ;;  %s213_s27 = scalar_lea.vmem %s691_s0, %s395_s10  ;;  %s281_s8 = scalar_lea.hbm %s694_s3, %s396_s5  ;;  %v232_v10 = vld [vmem:[%s693_s2] sm:$0xff]  ;;  %v233_v11 = vld [vmem:[%s693_s2 + $0x8] sm:$0xff] }
  0x18   : > { %v222_v8 = vld [vmem:[%s213_s27] sm:$0xff]  ;;  %v223_v9 = vld [vmem:[%s213_s27 + $0x8] sm:$0xff]  ;;  %s284_s23 = sshll.u32 %s281_s8, 4  ;;  %s268_s15 = scalar_lea.sflag [#allocation3], %s202_s30  ;;  %s285_s23 = int_to_ptr.hbm [resolvable:$true] %s284_s23 }
  0x19   : > { %251 = vmatpush.msra.mxu0 %v229_v2  ;;  %399 = vmatpush.msra.mxu1 %v229_v2  ;;  %s476_s26 = sshra.s32 %s285_s23, 4  ;;  %s477_s26 = int_to_ptr.hbm [resolvable:$true] %s476_s26 }
  0x1a   : > { %s478_s27 = scalar_lea.hbm %s477_s26, 16  ;;  %p483_p1 = scmp.lt.s32.totalorder %s477_s26, %s694_s3 }
  0x1b   : > { %252 = vmatpush.msra.mxu0 %v228_v3  ;;  %400 = vmatpush.msra.mxu1 %v228_v3  ;;  %p479_p12 = scmp.ne.s32.totalorder %s477_s26, %s478_s27  ;;  %p484_p2 = scmp.lt.s32.totalorder %s482_s4, %s478_s27 }
  0x1d   : > { %253 = vmatpush.msra.mxu0 %v227_v4  ;;  %401 = vmatpush.msra.mxu1 %v227_v4  ;;  %p480_p13 = pnand %p479_p12, %p604_p4  ;;  %p485_p3 = por %p484_p2, %p483_p1 }
  0x1f   : > { %254 = vmatpush.msra.mxu0 %v226_v5  ;;  %402 = vmatpush.msra.mxu1 %v226_v5  ;;  %p481_p0 = pneg %p480_p13 }
  0x21   : > { %255 = vmatpush.msra.mxu0 %v225_v6  ;;  %403 = vmatpush.msra.mxu1 %v225_v6  ;;  %p486_p5 = pnand %p485_p3, %p481_p0 }
  0x23   : > { %256 = vmatpush.msra.mxu0 %v224_v7  ;;  %404 = vmatpush.msra.mxu1 %v224_v7 }
  0x24   : > { %388 = vmatmul.msk.f32.vlgmr.msra.gmra.mxu0 %vm234_vm0, %v222_v8  ;;  %389 = vmatmul.msk.f32.vlgmr.msra.gmra.mxu1 %vm234_vm0, %v223_v9 }
  0xa1   : > { %v258_v12 = vpop.f32.mrf.mxu0  ;;  %v261_v13 = vpop.f32.mrf.mxu1 }
  0xa2   : > { %v259_v14 = vadd.f32 %v258_v12, %v232_v10  ;;  %v262_v15 = vadd.f32 %v261_v13, %v233_v11 }
  0xa4   : > { %265 = vst.msk [vmem:[%s204_s11] sm:$0xff] %vm264_vm1, %v259_v14 }
  0xa5   : > { %266 = vst.msk [vmem:[%s204_s11 + $0x8] sm:$0xff] %vm264_vm1, %v262_v15 }
  0xa6   : > { %489 = shalt.err (!%p486_p5)
}
  0xa7   : > { %s542_s30 = smov 128   ;;  %s543_s7 = smov 8  }
  0xa8   : > { %405 = dma.vmem_to_hbm [thread:$0]  (%p604_p4), %s283_s18, 256, %s285_s23, %s268_s15, %s542_s30, %s542_s30, %s543_s7  }
  0xa9 PF: > { %p411_p6 = scmp.ge.s32.totalorder %s540_s17, 2  ;;  %s299_s8 = sand.u32 1, %s520_s12  }
  0xaa   : > { %s300_s9 = scalar_lea.sflag [#allocation3], %s299_s8 }
  0xab   : > { %p408_p7 = pnand %p411_p6, %p611_p8 }
  0xad   : > { %p409_p9 = pneg %p408_p7 }
  0xaf   : > { %515 = dma.done.wait (%p409_p9), %s300_s9, 256  }
  0xb0   : > { %517 = vsyncadd (%p409_p9), %s300_s9, 4294967040  ;;  %s16_s17 = sadd.s32 1, %s540_s17   ;;  %s697_s12 = smov %s524_s13 }
  0xb1   : > { %p13_p10 = scmp.ge.s32.totalorder %s16_s17, 4   ;;  %s698_s13 = smov %s528_s14 }
  0xb2   : > { %s699_s14 = smov %s617_s25  ;;  %s700_s15 = smov %s536_s16 }
  0xb3   : > { %s701_s16 = smov %s703_s20  ;;  %15 = sbr.rel (!%p13_p10) target bundleno = 4 (0x4), region = 70 }
  0xb8   :  { %306 = vsyncpa [#allocation3], 1 }
  0xb9   :  { %308 = vsyncpa [#allocation3 + $0x1], 1 }

</bundles_post_ra>
